<compile_context>
chip_gen: v7x
topology: tpu7x:2x2x1
jax: 0.10.0
libtpu: 0.0.40
codegen_flags: <defaults>
</compile_context>

<pallas_src>
import functools

import jax
import jax.numpy as jnp
from jax.experimental import pallas as pl
from jax.experimental.pallas import tpu as pltpu

LANE = 128
SUBLANE = 8


def _insensitive_loss_kernel(yp_ref, y_ref, w_ref, num_ref, den_ref, *, valid_rows):
    c = pl.program_id(0)          # core-split axis ("parallel")
    i = pl.program_id(1)          # row-block axis ("arbitrary", accumulates)
    tm = yp_ref.shape[0]

    @pl.when(i == 0)
    def _():
        num_ref[...] = jnp.zeros_like(num_ref)
        den_ref[...] = jnp.zeros_like(den_ref)

    yp = yp_ref[...].astype(jnp.float32)
    yy = y_ref[...].astype(jnp.float32)
    ww = w_ref[...].astype(jnp.float32)

    # Row-validity mask: covers the ragged last block (M % tm != 0) and the
    # clamped duplicate blocks the load-balancing index_map can produce.
    base = (c * pl.num_programs(1) + i) * tm
    row_ids = base + jax.lax.broadcasted_iota(jnp.int32, (tm, LANE), 0)
    valid = row_ids < valid_rows

    diff = jnp.abs(yp - yy)
    # Zero where diff < 0.5 (strict, matching torch) or where the row is padding.
    drop = jnp.logical_or(diff < 0.5, jnp.logical_not(valid))
    prod = jnp.where(drop, 0.0, diff * ww)
    wmask = jnp.where(valid, ww, 0.0)

    # Fold the (tm, 128) tile into vreg-shaped (8, 128) partials with pure VPU
    # adds; the expensive full cross-lane reduce happens once, outside the loop.
    num_ref[...] += prod.reshape(tm // SUBLANE, SUBLANE, LANE).sum(axis=0)
    den_ref[...] += wmask.reshape(tm // SUBLANE, SUBLANE, LANE).sum(axis=0)


def insensitive_loss(y_pred, y, w, *, row_tile=2048, core_split=2):
    assert y_pred.shape == y.shape == w.shape
    assert row_tile % SUBLANE == 0 and row_tile > 0
    out_dtype = jnp.result_type(y_pred.dtype, y.dtype, w.dtype)

    # Keep native dtypes in HBM; cast to f32 inside the kernel.
    yp = y_pred.reshape(-1)
    yy = y.reshape(-1)
    ww = w.reshape(-1)

    total = yp.shape[0]
    chunk = SUBLANE * LANE
    padded = -(-total // chunk) * chunk
    pad = padded - total
    if pad:
        # Only for non-(8*128)-aligned sizes; zeros contribute nothing to
        # either the numerator or the denominator.
        yp = jnp.pad(yp, (0, pad))
        yy = jnp.pad(yy, (0, pad))
        ww = jnp.pad(ww, (0, pad))

    M = padded // LANE                      # rows, multiple of 8
    yp2 = yp.reshape(M, LANE)
    yy2 = yy.reshape(M, LANE)
    ww2 = ww.reshape(M, LANE)

    tm = M if M <= row_tile else row_tile   # multiple of 8 either way
    nblk = -(-M // tm)                      # total row-blocks
    ncores = min(core_split, nblk)          # v7x: 2 TCs; single-TC chips just loop
    nsteps = -(-nblk // ncores)             # row-blocks per core

    def in_map(c, i):
        # Clamp so an uneven core split never addresses past the array; the
        # duplicated block is fully masked out in the kernel.
        blk = jnp.minimum(c * nsteps + i, nblk - 1)
        return (blk, 0)

    in_spec = pl.BlockSpec((tm, LANE), in_map)
    out_spec = pl.BlockSpec((SUBLANE, LANE), lambda c, i: (c, 0))

    kernel = functools.partial(_insensitive_loss_kernel, valid_rows=M)

    num_part, den_part = pl.pallas_call(
        kernel,
        out_shape=(
            jax.ShapeDtypeStruct((ncores * SUBLANE, LANE), jnp.float32),
            jax.ShapeDtypeStruct((ncores * SUBLANE, LANE), jnp.float32),
        ),
        grid_spec=pltpu.PrefetchScalarGridSpec(
            num_scalar_prefetch=0,
            grid=(ncores, nsteps),
            in_specs=[in_spec, in_spec, in_spec],
            out_specs=[out_spec, out_spec],
        ),
        compiler_params=pltpu.CompilerParams(
            dimension_semantics=("parallel", "arbitrary"),
        ),
    )(yp2, yy2, ww2)

    # Tiny epilogue: single tree reduce of 2 x (8,128) partials + the division.
    loss = jnp.sum(num_part) / jnp.sum(den_part)
    return loss.astype(out_dtype)


def _reference(y_pred, y, w):
    diff = jnp.abs(y_pred - y)
    diff = jnp.where(diff < 0.5, 0.0, diff)
    return jnp.sum(diff * w) / jnp.sum(w)


if __name__ == "__main__":
    key = jax.random.PRNGKey(0)
    k1, k2, k3 = jax.random.split(key, 3)
    shape = (2, 4, 16, 16)  # 2048 elements
    y_pred = jax.random.normal(k1, shape, dtype=jnp.float32) * 2.0
    y = jax.random.normal(k2, shape, dtype=jnp.float32) * 2.0
    w = jax.random.uniform(k3, shape, dtype=jnp.float32) + 0.1

    loss = insensitive_loss(y_pred, y, w)
    jax.block_until_ready(loss)

    ref = _reference(y_pred, y, w)
    assert jnp.allclose(loss, ref, rtol=1e-5, atol=1e-5), (loss, ref)
    print("KERNEL_OK")
</pallas_src>

<mosaic_0001>
module attributes {stable_mosaic.version = 11 : i64} {
  func.func @_insensitive_loss_kernel(%arg0: i32, %arg1: i32, %arg2: memref<16x128xf32, #tpu.memory_space<vmem>>, %arg3: memref<16x128xf32, #tpu.memory_space<vmem>>, %arg4: memref<16x128xf32, #tpu.memory_space<vmem>>, %arg5: memref<8x128xf32, #tpu.memory_space<vmem>>, %arg6: memref<8x128xf32, #tpu.memory_space<vmem>>) attributes {dimension_semantics = [#tpu.dimension_semantics<parallel>, #tpu.dimension_semantics<arbitrary>], iteration_bounds = array<i64: 1, 1>, scalar_prefetch = 0 : i64, scratch_operands = 0 : i64, tpu.core_type = #tpu.core_type<tc>, window_params = [{transform_indices = @transform_0, window_bounds = array<i64: 16, 128>}, {transform_indices = @transform_1, window_bounds = array<i64: 16, 128>}, {transform_indices = @transform_2, window_bounds = array<i64: 16, 128>}, {transform_indices = @transform_3, window_bounds = array<i64: 8, 128>}, {transform_indices = @transform_4, window_bounds = array<i64: 8, 128>}]} {
    %c0_i32 = arith.constant 0 : i32
    %0 = arith.cmpi eq, %arg1, %c0_i32 : i32
    %1 = arith.extui %0 : i1 to i32
    %c0_i32_0 = arith.constant 0 : i32
    %2 = arith.cmpi ne, %1, %c0_i32_0 : i32
    scf.if %2 {
      %cst_20 = arith.constant 0.000000e+00 : f32
      %35 = vector.broadcast %cst_20 : f32 to vector<8x128xf32>
      %c0_21 = arith.constant 0 : index
      %c0_22 = arith.constant 0 : index
      %36 = vector.load %arg5[%c0_21, %c0_22] : memref<8x128xf32, #tpu.memory_space<vmem>>, vector<8x128xf32>
      tpu.vector_store %arg5[%c0_21, %c0_22], %35 {strides = array<i32>} : memref<8x128xf32, #tpu.memory_space<vmem>>, vector<8x128xf32>,
      %cst_23 = arith.constant 0.000000e+00 : f32
      %37 = vector.broadcast %cst_23 : f32 to vector<8x128xf32>
      %c0_24 = arith.constant 0 : index
      %c0_25 = arith.constant 0 : index
      %38 = vector.load %arg6[%c0_24, %c0_25] : memref<8x128xf32, #tpu.memory_space<vmem>>, vector<8x128xf32>
      tpu.vector_store %arg6[%c0_24, %c0_25], %37 {strides = array<i32>} : memref<8x128xf32, #tpu.memory_space<vmem>>, vector<8x128xf32>,
    } else {
    }
    %c0 = arith.constant 0 : index
    %c0_1 = arith.constant 0 : index
    %3 = vector.load %arg2[%c0, %c0_1] : memref<16x128xf32, #tpu.memory_space<vmem>>, vector<16x128xf32>
    %c0_2 = arith.constant 0 : index
    %c0_3 = arith.constant 0 : index
    %4 = vector.load %arg3[%c0_2, %c0_3] : memref<16x128xf32, #tpu.memory_space<vmem>>, vector<16x128xf32>
    %c0_4 = arith.constant 0 : index
    %c0_5 = arith.constant 0 : index
    %5 = vector.load %arg4[%c0_4, %c0_5] : memref<16x128xf32, #tpu.memory_space<vmem>>, vector<16x128xf32>
    %c1_i32 = arith.constant 1 : i32
    %6 = arith.muli %arg0, %c1_i32 : i32
    %7 = arith.addi %6, %arg1 : i32
    %c16_i32 = arith.constant 16 : i32
    %8 = arith.muli %7, %c16_i32 : i32
    %9 = tpu.iota {dimensions = array<i32: 0>} : vector<16x128xi32>
    %10 = vector.broadcast %8 : i32 to vector<16x128xi32>
    %11 = arith.addi %10, %9 : vector<16x128xi32>
    %c16_i32_6 = arith.constant 16 : i32
    %12 = vector.broadcast %c16_i32_6 : i32 to vector<16x128xi32>
    %13 = arith.cmpi slt, %11, %12 : vector<16x128xi32>
    %14 = arith.subf %3, %4 : vector<16x128xf32>
    %15 = math.absf %14 : vector<16x128xf32>
    %cst = arith.constant 5.000000e-01 : f32
    %16 = vector.broadcast %cst : f32 to vector<16x128xf32>
    %17 = arith.cmpf olt, %15, %16 : vector<16x128xf32>
    %cst_7 = arith.constant dense<true> : vector<16x128xi1>
    %18 = arith.xori %13, %cst_7 : vector<16x128xi1>
    %19 = arith.ori %17, %18 : vector<16x128xi1>
    %20 = arith.mulf %15, %5 : vector<16x128xf32>
    %cst_8 = arith.constant 0.000000e+00 : f32
    %21 = vector.broadcast %cst_8 : f32 to vector<16x128xf32>
    %22 = arith.select %19, %21, %20 : vector<16x128xi1>, vector<16x128xf32>
    %cst_9 = arith.constant 0.000000e+00 : f32
    %23 = vector.broadcast %cst_9 : f32 to vector<16x128xf32>
    %24 = arith.select %13, %5, %23 : vector<16x128xi1>, vector<16x128xf32>
    %c0_10 = arith.constant 0 : index
    %c0_11 = arith.constant 0 : index
    %25 = vector.load %arg5[%c0_10, %c0_11] : memref<8x128xf32, #tpu.memory_space<vmem>>, vector<8x128xf32>
    %26 = vector.shape_cast %22 : vector<16x128xf32> to vector<2x8x128xf32>
    %cst_12 = arith.constant dense<0.000000e+00> : vector<8x128xf32>
    %27 = vector.multi_reduction <add>, %26, %cst_12 [0] : vector<2x8x128xf32> to vector<8x128xf32>
    %28 = arith.addf %25, %27 : vector<8x128xf32>
    %c0_13 = arith.constant 0 : index
    %c0_14 = arith.constant 0 : index
    %29 = vector.load %arg5[%c0_13, %c0_14] : memref<8x128xf32, #tpu.memory_space<vmem>>, vector<8x128xf32>
    tpu.vector_store %arg5[%c0_13, %c0_14], %28 {strides = array<i32>} : memref<8x128xf32, #tpu.memory_space<vmem>>, vector<8x128xf32>,
    %c0_15 = arith.constant 0 : index
    %c0_16 = arith.constant 0 : index
    %30 = vector.load %arg6[%c0_15, %c0_16] : memref<8x128xf32, #tpu.memory_space<vmem>>, vector<8x128xf32>
    %31 = vector.shape_cast %24 : vector<16x128xf32> to vector<2x8x128xf32>
    %cst_17 = arith.constant dense<0.000000e+00> : vector<8x128xf32>
    %32 = vector.multi_reduction <add>, %31, %cst_17 [0] : vector<2x8x128xf32> to vector<8x128xf32>
    %33 = arith.addf %30, %32 : vector<8x128xf32>
    %c0_18 = arith.constant 0 : index
    %c0_19 = arith.constant 0 : index
    %34 = vector.load %arg6[%c0_18, %c0_19] : memref<8x128xf32, #tpu.memory_space<vmem>>, vector<8x128xf32>
    tpu.vector_store %arg6[%c0_18, %c0_19], %33 {strides = array<i32>} : memref<8x128xf32, #tpu.memory_space<vmem>>, vector<8x128xf32>,
    return
  }
  func.func @transform_0(%arg0: i32, %arg1: i32) -> (i32, i32) {
    %c1_i32 = arith.constant 1 : i32
    %0 = arith.muli %arg0, %c1_i32 : i32
    %1 = arith.addi %0, %arg1 : i32
    %c0_i32 = arith.constant 0 : i32
    %2 = arith.minsi %1, %c0_i32 : i32
    %c0_i32_0 = arith.constant 0 : i32
    %c0_i32_1 = arith.constant 0 : i32
    return %2, %c0_i32_0 : i32, i32
  }
  func.func @transform_1(%arg0: i32, %arg1: i32) -> (i32, i32) {
    %c1_i32 = arith.constant 1 : i32
    %0 = arith.muli %arg0, %c1_i32 : i32
    %1 = arith.addi %0, %arg1 : i32
    %c0_i32 = arith.constant 0 : i32
    %2 = arith.minsi %1, %c0_i32 : i32
    %c0_i32_0 = arith.constant 0 : i32
    %c0_i32_1 = arith.constant 0 : i32
    return %2, %c0_i32_0 : i32, i32
  }
  func.func @transform_2(%arg0: i32, %arg1: i32) -> (i32, i32) {
    %c1_i32 = arith.constant 1 : i32
    %0 = arith.muli %arg0, %c1_i32 : i32
    %1 = arith.addi %0, %arg1 : i32
    %c0_i32 = arith.constant 0 : i32
    %2 = arith.minsi %1, %c0_i32 : i32
    %c0_i32_0 = arith.constant 0 : i32
    %c0_i32_1 = arith.constant 0 : i32
    return %2, %c0_i32_0 : i32, i32
  }
  func.func @transform_3(%arg0: i32, %arg1: i32) -> (i32, i32) {
    %c0_i32 = arith.constant 0 : i32
    %c0_i32_0 = arith.constant 0 : i32
    return %arg0, %c0_i32 : i32, i32
  }
  func.func @transform_4(%arg0: i32, %arg1: i32) -> (i32, i32) {
    %c0_i32 = arith.constant 0 : i32
    %c0_i32_0 = arith.constant 0 : i32
    return %arg0, %c0_i32 : i32, i32
  }
}

</mosaic_0001>

<bundles_post_ra>
// kernel: tpu_custom_call.1
= control target key start
LH: loop header
LB: loop body
LE: loop exit
PB: predicated region body
PF: predicated region fallthrough
CT: control target
= control target key end

     0   :  { %10 = vsyncpa [#allocation3], 0  ;;  %s406_s0 = inlined_call_operand.hbm [shape: f32[16,128], index: 0, kind: input, shape index: {}]   ;;  %s407_s1 = inlined_call_operand.hbm [shape: f32[16,128], index: 1, kind: input, shape index: {}]   ;;  %s408_s2 = inlined_call_operand.hbm [shape: f32[16,128], index: 2, kind: input, shape index: {}]   ;;  %s409_s3 = inlined_call_operand.hbm [shape: f32[8,128], index: 3, kind: output, shape index: {0}]   ;;  %s410_s4 = inlined_call_operand.hbm [shape: f32[8,128], index: 4, kind: output, shape index: {1}]  }
   0x1   :  { %11 = vsyncpa [#allocation6], 0 }
   0x2   :  { %12 = vsyncpa [#allocation4], 0 }
   0x3   :  { %13 = vsyncpa [#allocation10], 0  ;;  %s297_s15 = smov [#allocation5]   ;;  %s298_s17 = smov [#allocation2]  }
   0x4   :  { %s43_s16 = sshll.u32 %s297_s15, 4  ;;  %s25_s18 = sshll.u32 %s298_s17, 4  ;;  %s44_s16 = int_to_ptr.vmem [resolvable:$true] %s43_s16  ;;  %s329_s18 = int_to_ptr.vmem [resolvable:$true] %s25_s18 }
   0x5   :  { %s179_s21 = scalar_lea.hbm %s407_s1, 256 }
   0x6   :  { %p180_p0 = scmp.ne.s32.totalorder %s407_s1, %s179_s21  ;;  %p183_p1 = scmp.lt.u32.totalorder %s179_s21, %s407_s1 }
   0x8   :  { %p185_p2 = pnand %p183_p1, %p180_p0 }
   0xa   :  { %188 = shalt.err (!%p185_p2)
}
   0xb   :  { %s189_s26 = scalar_lea.vmem %s44_s16, 256  ;;  %p194_p4 = scmp.lt.s32.totalorder %s44_s16, %s44_s16 }
   0xc   :  { %p190_p3 = scmp.ne.s32.totalorder %s44_s16, %s189_s26  ;;  %p195_p5 = scmp.lt.s32.totalorder %s189_s26, %s189_s26 }
   0xe   :  { %p196_p6 = por %p195_p5, %p194_p4 }
  0x10   :  { %p197_p7 = pnand %p196_p6, %p190_p3 }
  0x12   :  { %200 = shalt.err (!%p197_p7)
}
  0x13   :  { %s299_s27 = smov 128   ;;  %s300_s28 = smov 8  }
  0x14   :  { %49 = dma.hbm_to_vmem [thread:$0]  %s407_s1, 256, %s44_s16, [#allocation6], %s299_s27, %s299_s27, %s300_s28  }
  0x15   :  { %s201_s7 = scalar_lea.hbm %s406_s0, 256 }
  0x16   :  { %p202_p8 = scmp.ne.s32.totalorder %s406_s0, %s201_s7  ;;  %p205_p9 = scmp.lt.u32.totalorder %s201_s7, %s406_s0 }
  0x18   :  { %p207_p10 = pnand %p205_p9, %p202_p8 }
  0x1a   :  { %210 = shalt.err (!%p207_p10)
}
  0x1b   :  { %s211_s12 = scalar_lea.vmem %s329_s18, 256  ;;  %p216_p12 = scmp.lt.s32.totalorder %s329_s18, %s329_s18 }
  0x1c   :  { %p212_p11 = scmp.ne.s32.totalorder %s329_s18, %s211_s12  ;;  %p217_p13 = scmp.lt.s32.totalorder %s211_s12, %s211_s12 }
  0x1e   :  { %p218_p0 = por %p217_p13, %p216_p12 }
  0x20   :  { %p219_p1 = pnand %p218_p0, %p212_p11 }
  0x22   :  { %222 = shalt.err (!%p219_p1)
}
  0x23   :  { %31 = dma.hbm_to_vmem [thread:$0]  %s406_s0, 256, %s329_s18, [#allocation3], %s299_s27, %s299_s27, %s300_s28  }
  0x24   :  { %s301_s14 = smov [#allocation7]   ;;  %s223_s19 = scalar_lea.hbm %s408_s2, 256 }
  0x25   :  { %s61_s15 = sshll.u32 %s301_s14, 4  ;;  %p224_p2 = scmp.ne.s32.totalorder %s408_s2, %s223_s19  ;;  %s62_s15 = int_to_ptr.vmem [resolvable:$true] %s61_s15 }
  0x26   :  { %p227_p3 = scmp.lt.u32.totalorder %s223_s19, %s408_s2 }
  0x28   :  { %p229_p4 = pnand %p227_p3, %p224_p2 }
  0x2a   :  { %232 = shalt.err (!%p229_p4)
}
  0x2b   :  { %s233_s24 = scalar_lea.vmem %s62_s15, 256  ;;  %p238_p6 = scmp.lt.s32.totalorder %s62_s15, %s62_s15 }
  0x2c   :  { %p234_p5 = scmp.ne.s32.totalorder %s62_s15, %s233_s24  ;;  %p239_p7 = scmp.lt.s32.totalorder %s233_s24, %s233_s24 }
  0x2e   :  { %p240_p8 = por %p239_p7, %p238_p6 }
  0x30   :  { %p241_p9 = pnand %p240_p8, %p234_p5 }
  0x32   :  { %244 = shalt.err (!%p241_p9)
}
  0x33   :  { %67 = dma.hbm_to_vmem [thread:$0]  %s408_s2, 256, %s62_s15, [#allocation6], %s299_s27, %s299_s27, %s300_s28  }
  0x34   :  { %289 = dma.done.wait [#allocation3], 256  }
  0x35   :  { %290 = vsyncadd [#allocation3], 4294967040 }
  0x36   :  { %291 = dma.done.wait [#allocation6], 512  }
  0x37   :  { %292 = vsyncadd [#allocation6], 4294966784  ;;  %v95_v0 = vld [vmem:[#allocation2] sm:$0xff]  ;;  %v96_v1 = vld [vmem:[#allocation2 + $0x8] sm:$0xff]  ;;  %s302_s25 = smov [#allocation9]  }
  0x38   :  { %v97_v2 = vld [vmem:[#allocation5] sm:$0xff]  ;;  %v98_v3 = vld [vmem:[#allocation5 + $0x8] sm:$0xff]  ;;  %v99_v4 = vld [vmem:[#allocation7] sm:$0xff]  ;;  %s151_s26 = sshll.u32 %s302_s25, 4  ;;  %s152_s26 = int_to_ptr.vmem [resolvable:$true] %s151_s26 }
  0x39   :  { %v100_v5 = vld [vmem:[#allocation7 + $0x8] sm:$0xff]  ;;  %v111_v6 = vsub.f32 %v95_v0, %v97_v2  ;;  %v112_v7 = vsub.f32 %v96_v1, %v98_v3  ;;  %s245_s2 = scalar_lea.vmem %s152_s26, 128  ;;  %p250_p11 = scmp.lt.s32.totalorder %s152_s26, %s152_s26 }
  0x3a   :  { %v132_v8 = vadd.f32 %v100_v5, %v99_v4  ;;  %p246_p10 = scmp.ne.s32.totalorder %s152_s26, %s245_s2  ;;  %p251_p12 = scmp.lt.s32.totalorder %s245_s2, %s245_s2 }
  0x3b   :  { %v113_v9 = vand.u32 2147483647, %v111_v6  ;;  %v114_v10 = vand.u32 2147483647, %v112_v7 }
  0x3c   :  { %134 = vst [vmem:[#allocation9] sm:$0xff] %v132_v8  ;;  %p252_p13 = por %p251_p12, %p250_p11 }
  0x3d   :  { %vm115_vm0 = vcmp.lt.f32.partialorder %v113_v9, 0.5  ;;  %v121_v11 = vmul.f32 %v113_v9, %v99_v4  ;;  %vm116_vm1 = vcmp.lt.f32.partialorder %v114_v10, 0.5  ;;  %v122_v12 = vmul.f32 %v114_v10, %v100_v5 }
  0x3e   :  { %p253_p0 = pnand %p252_p13, %p246_p10 }
  0x3f   :  { %v123_v13 = vsel %vm115_vm0, 0.0, %v121_v11 }
  0x40   :  { %256 = shalt.err (!%p253_p0)
}
  0x41   :  { %s257_s29 = scalar_lea.hbm %s410_s4, 128 }
  0x42   :  { %p258_p1 = scmp.ne.s32.totalorder %s410_s4, %s257_s29  ;;  %p261_p2 = scmp.lt.u32.totalorder %s257_s29, %s410_s4 }
  0x44   :  { %p263_p3 = pnand %p261_p2, %p258_p1 }
  0x46   :  { %266 = shalt.err (!%p263_p3)
}
  0x47   :  { %154 = dma.vmem_to_hbm [thread:$0]  %s152_s26, 128, %s410_s4, [#allocation10]   ;;  %v124_v14 = vsel %vm116_vm1, 0.0, %v122_v12 }
  0x48   :  { %s303_s10 = smov [#allocation8]   ;;  %v128_v15 = vadd.f32 %v124_v14, %v123_v13 }
  0x49   :  { %s141_s11 = sshll.u32 %s303_s10, 4  ;;  %s142_s11 = int_to_ptr.vmem [resolvable:$true] %s141_s11 }
  0x4a   :  { %130 = vst [vmem:[#allocation8] sm:$0xff] %v128_v15  ;;  %s267_s12 = scalar_lea.vmem %s142_s11, 128  ;;  %p272_p5 = scmp.lt.s32.totalorder %s142_s11, %s142_s11 }
  0x4b   :  { %p268_p4 = scmp.ne.s32.totalorder %s142_s11, %s267_s12  ;;  %p273_p6 = scmp.lt.s32.totalorder %s267_s12, %s267_s12 }
  0x4d   :  { %p274_p7 = por %p273_p6, %p272_p5 }
  0x4f   :  { %p275_p8 = pnand %p274_p7, %p268_p4 }
  0x51   :  { %278 = shalt.err (!%p275_p8)
}
  0x52   :  { %s279_s14 = scalar_lea.hbm %s409_s3, 128 }
  0x53   :  { %p280_p9 = scmp.ne.s32.totalorder %s409_s3, %s279_s14  ;;  %p283_p10 = scmp.lt.u32.totalorder %s279_s14, %s409_s3 }
  0x55   :  { %p285_p11 = pnand %p283_p10, %p280_p9 }
  0x57   :  { %288 = shalt.err (!%p285_p11)
}
  0x58   :  { %144 = dma.vmem_to_hbm [thread:$0]  %s142_s11, 128, %s409_s3, [#allocation4]  }
  0x59   :  { %293 = dma.done.wait [#allocation4], 128  }
  0x5a   :  { %294 = vsyncadd [#allocation4], 4294967168 }
  0x5b   :  { %295 = dma.done.wait [#allocation10], 128  }
  0x5c   :  { %296 = vsyncadd [#allocation10], 4294967168 }
  0x5d   :  { %161 = vsyncpa [#allocation3], 1 }
  0x5e   :  { %162 = vsyncpa [#allocation6], 1 }
  0x5f   :  { %163 = vsyncpa [#allocation4], 1 }
  0x60   :  { %164 = vsyncpa [#allocation10], 1 }

</bundles_post_ra>
